<compile_context>
chip_gen: v7x
topology: tpu7x:2x2x1
jax: 0.10.0
libtpu: 0.0.40
codegen_flags: <defaults>
</compile_context>

<pallas_src>
import functools

import jax
import jax.numpy as jnp
from jax.experimental import pallas as pl
from jax.experimental.pallas import tpu as pltpu


def _contrastive_head_kernel(pos_ref, neg_ref, out_ref, m_ref, l_ref, *,
                             inv_temperature, n_total, k_total, tm, tk,
                             mask_rows, mask_cols):
    # pos_ref: (TM, 1)   neg_ref: (TM, TK)   out_ref: (1, 8, 128)
    # m_ref / l_ref: (TM, 1) f32 VMEM scratch (online-LSE running max / sum).
    mi = pl.program_id(0)
    ki = pl.program_id(1)
    nk = pl.num_programs(1)

    # Scaled positive logit (tiny (TM, 1) tile; block is resident across K).
    pos = pos_ref[...].astype(jnp.float32) * inv_temperature

    # ---- init online-LSE state at the first K tile of this row block -------
    @pl.when(ki == 0)
    def _():
        m_ref[...] = pos                       # running max seeded with positive
        l_ref[...] = jnp.ones_like(l_ref)      # exp(pos - pos) == 1

    # ---- one online-logsumexp step over this (TM, TK) negatives tile -------
    neg_raw = neg_ref[...]
    if mask_cols:
        col = ki * tk + jax.lax.broadcasted_iota(jnp.int32, neg_raw.shape, 1)
        col_ok = col < k_total
        neg_for_max = jnp.where(col_ok, neg_raw,
                                jnp.asarray(-jnp.inf, neg_raw.dtype))
    else:
        neg_for_max = neg_raw

    # max commutes with the positive scale 1/T -> take it on the raw tile and
    # fold scale/cast into the exp (no scaled (TM, TK) f32 temp is kept live).
    m_tile = (jnp.max(neg_for_max, axis=-1, keepdims=True).astype(jnp.float32)
              * inv_temperature)
    m_new = jnp.maximum(m_ref[...], m_tile)

    e = jnp.exp(neg_raw.astype(jnp.float32) * inv_temperature - m_new)
    if mask_cols:
        e = jnp.where(col_ok, e, 0.0)

    l_ref[...] = (l_ref[...] * jnp.exp(m_ref[...] - m_new)
                  + jnp.sum(e, axis=-1, keepdims=True))
    m_ref[...] = m_new

    # ---- finalize this row block on the last K tile -------------------------
    @pl.when(ki == nk - 1)
    def _():
        lse = jnp.log(l_ref[...]) + m_ref[...]          # (TM, 1)
        nll = lse - pos                                 # CE with label = col 0
        if mask_rows:
            row = mi * tm + jax.lax.broadcasted_iota(jnp.int32, nll.shape, 0)
            nll = jnp.where(row < n_total, nll, 0.0)
        partial = jnp.sum(nll)                          # scalar f32
        # One partial per row block, stored at [0, 0] of a lane-dense,
        # (8,128)-aligned output block (rest zeros); wrapper sums everything.
        sub = jax.lax.broadcasted_iota(jnp.int32, (8, 128), 0)
        lane = jax.lax.broadcasted_iota(jnp.int32, (8, 128), 1)
        out_ref[...] = jnp.where((sub == 0) & (lane == 0), partial, 0.0)[None]


def _pick_tiles(n, k, itemsize, target_bytes=8 * 1024 * 1024):
    """Pick (TM, TK) so one negatives tile is ~target_bytes (double-buffered by
    the BlockSpec pipeline).  TK is lane-dense (multiple of 128) unless it
    covers all of K; TM is sublane-aligned (multiple of 8) unless it covers all
    of N.  No artificial row cap — big tiles amortise the ~0.35 us/step
    pipeline overhead and keep the HBM stream near roofline."""
    if k * itemsize * 256 <= target_bytes:
        tk = k                                   # full-K rows fit comfortably
    else:
        tk = (target_bytes // (512 * itemsize)) // 128 * 128
        tk = max(128, tk)
        if tk >= k:
            tk = k
    tm = (target_bytes // max(1, tk * itemsize)) // 8 * 8
    if tm <= 0 or tm >= n:
        tm = n                                   # single full row block
    return tm, tk


def contrastive_head(pos, neg, temperature=0.2, *,
                     block_rows=None, block_cols=None):
    """pos: (N, 1) sim scores; neg: (N, K) sim scores -> scalar f32 loss."""
    n, one = pos.shape
    assert one == 1, "pos must be (batch, 1)"
    n2, k = neg.shape
    assert n2 == n
    assert temperature > 0.0, "max/scale folding requires temperature > 0"

    tm, tk = _pick_tiles(n, k, jnp.dtype(neg.dtype).itemsize)
    if block_rows is not None:                   # optional overrides (testing)
        tm = min(block_rows, n)
        if tm < n:
            tm = max(8, (tm // 8) * 8)
    if block_cols is not None:
        tk = min(block_cols, k)
        if tk < k:
            tk = max(128, (tk // 128) * 128)

    gm = pl.cdiv(n, tm)
    gk = pl.cdiv(k, tk)

    kernel = functools.partial(
        _contrastive_head_kernel,
        inv_temperature=float(1.0 / temperature),   # plain float -> immediate
        n_total=n, k_total=k, tm=tm, tk=tk,
        mask_rows=(n % tm != 0), mask_cols=(k % tk != 0),
    )

    partials = pl.pallas_call(
        kernel,
        out_shape=jax.ShapeDtypeStruct((gm, 8, 128), jnp.float32),
        grid=(gm, gk),
        in_specs=[
            pl.BlockSpec((tm, 1), lambda i, j: (i, 0)),
            pl.BlockSpec((tm, tk), lambda i, j: (i, j)),
        ],
        out_specs=pl.BlockSpec((1, 8, 128), lambda i, j: (i, 0, 0)),
        scratch_shapes=[
            pltpu.VMEM((tm, 1), jnp.float32),    # running max  m
            pltpu.VMEM((tm, 1), jnp.float32),    # running sum  l
        ],
        compiler_params=pltpu.CompilerParams(
            dimension_semantics=("parallel", "arbitrary"),
            vmem_limit_bytes=64 * 1024 * 1024,
        ),
    )(pos, neg)

    # Tiny final reduce + mean in the wrapper (keeps the grid parallel).
    return jnp.sum(partials) / jnp.float32(n)


def _reference(pos, neg, temperature=0.2):
    logits = jnp.concatenate([pos, neg], axis=1).astype(jnp.float32) / temperature
    lse = jax.nn.logsumexp(logits, axis=-1)
    return jnp.mean(lse - logits[:, 0])


if __name__ == "__main__":
    # No learnable parameters in this module (CrossEntropyLoss + temperature).
    key = jax.random.PRNGKey(0)
    k1, k2, k3, k4 = jax.random.split(key, 4)

    # Small demo shape (single-tile path).
    N, K = 8, 16
    pos = jax.random.normal(k1, (N, 1), dtype=jnp.float32)
    neg = jax.random.normal(k2, (N, K), dtype=jnp.float32)
    loss = jax.block_until_ready(contrastive_head(pos, neg, temperature=0.2))
    ref = _reference(pos, neg, temperature=0.2)
    assert jnp.allclose(loss, ref, rtol=1e-5, atol=1e-5), (loss, ref)

    # Second small case forcing multi-tile grid + row/col masking paths.
    N2, K2 = 20, 200
    pos2 = jax.random.normal(k3, (N2, 1), dtype=jnp.float32)
    neg2 = jax.random.normal(k4, (N2, K2), dtype=jnp.float32)
    loss2 = jax.block_until_ready(
        contrastive_head(pos2, neg2, temperature=0.2, block_rows=8, block_cols=128))
    ref2 = _reference(pos2, neg2, temperature=0.2)
    assert jnp.allclose(loss2, ref2, rtol=1e-5, atol=1e-5), (loss2, ref2)

    print("KERNEL_OK")
</pallas_src>

<mosaic_0001>
module attributes {stable_mosaic.version = 11 : i64} {
  func.func @_contrastive_head_kernel(%arg0: i32, %arg1: i32, %arg2: memref<8x1xf32, #tpu.memory_space<vmem>>, %arg3: memref<8x16xf32, #tpu.memory_space<vmem>>, %arg4: memref<1x8x128xf32, #tpu.memory_space<vmem>>, %arg5: memref<8x1xf32, #tpu.memory_space<vmem>>, %arg6: memref<8x1xf32, #tpu.memory_space<vmem>>) attributes {dimension_semantics = [#tpu.dimension_semantics<parallel>, #tpu.dimension_semantics<arbitrary>], iteration_bounds = array<i64: 1, 1>, scalar_prefetch = 0 : i64, scratch_operands = 2 : i64, tpu.core_type = #tpu.core_type<tc>, window_params = [{transform_indices = @transform_0, window_bounds = array<i64: 8, 1>}, {transform_indices = @transform_1, window_bounds = array<i64: 8, 16>}, {transform_indices = @transform_2, window_bounds = array<i64: 1, 8, 128>}]} {
    %c0 = arith.constant 0 : index
    %c0_0 = arith.constant 0 : index
    %0 = vector.load %arg2[%c0, %c0_0] : memref<8x1xf32, #tpu.memory_space<vmem>>, vector<8x1xf32>
    %cst = arith.constant 5.000000e+00 : f32
    %1 = vector.broadcast %cst : f32 to vector<8x1xf32>
    %2 = arith.mulf %0, %1 : vector<8x1xf32>
    %c0_i32 = arith.constant 0 : i32
    %3 = arith.cmpi eq, %arg1, %c0_i32 : i32
    %4 = arith.extui %3 : i1 to i32
    %c0_i32_1 = arith.constant 0 : i32
    %5 = arith.cmpi ne, %4, %c0_i32_1 : i32
    scf.if %5 {
      %c0_20 = arith.constant 0 : index
      %c0_21 = arith.constant 0 : index
      %31 = vector.load %arg5[%c0_20, %c0_21] : memref<8x1xf32, #tpu.memory_space<vmem>>, vector<8x1xf32>
      tpu.vector_store %arg5[%c0_20, %c0_21], %2 {strides = array<i32>} : memref<8x1xf32, #tpu.memory_space<vmem>>, vector<8x1xf32>,
      %cst_22 = arith.constant 1.000000e+00 : f32
      %32 = vector.broadcast %cst_22 : f32 to vector<8x1xf32>
      %c0_23 = arith.constant 0 : index
      %c0_24 = arith.constant 0 : index
      %33 = vector.load %arg6[%c0_23, %c0_24] : memref<8x1xf32, #tpu.memory_space<vmem>>, vector<8x1xf32>
      tpu.vector_store %arg6[%c0_23, %c0_24], %32 {strides = array<i32>} : memref<8x1xf32, #tpu.memory_space<vmem>>, vector<8x1xf32>,
    } else {
    }
    %c0_2 = arith.constant 0 : index
    %c0_3 = arith.constant 0 : index
    %6 = vector.load %arg3[%c0_2, %c0_3] : memref<8x16xf32, #tpu.memory_space<vmem>>, vector<8x16xf32>
    %cst_4 = arith.constant dense<0xFF800000> : vector<8xf32>
    %7 = vector.multi_reduction <maximumf>, %6, %cst_4 [1] : vector<8x16xf32> to vector<8xf32>
    %8 = vector.shape_cast %7 : vector<8xf32> to vector<8x1xf32>
    %cst_5 = arith.constant 5.000000e+00 : f32
    %9 = vector.broadcast %cst_5 : f32 to vector<8x1xf32>
    %10 = arith.mulf %8, %9 : vector<8x1xf32>
    %c0_6 = arith.constant 0 : index
    %c0_7 = arith.constant 0 : index
    %11 = vector.load %arg5[%c0_6, %c0_7] : memref<8x1xf32, #tpu.memory_space<vmem>>, vector<8x1xf32>
    %12 = arith.maximumf %11, %10 : vector<8x1xf32>
    %cst_8 = arith.constant 5.000000e+00 : f32
    %13 = vector.broadcast %cst_8 : f32 to vector<8x16xf32>
    %14 = arith.mulf %6, %13 : vector<8x16xf32>
    %15 = vector.broadcast %12 : vector<8x1xf32> to vector<8x16xf32>
    %16 = arith.subf %14, %15 : vector<8x16xf32>
    %17 = math.exp %16 : vector<8x16xf32>
    %c0_9 = arith.constant 0 : index
    %c0_10 = arith.constant 0 : index
    %18 = vector.load %arg6[%c0_9, %c0_10] : memref<8x1xf32, #tpu.memory_space<vmem>>, vector<8x1xf32>
    %c0_11 = arith.constant 0 : index
    %c0_12 = arith.constant 0 : index
    %19 = vector.load %arg5[%c0_11, %c0_12] : memref<8x1xf32, #tpu.memory_space<vmem>>, vector<8x1xf32>
    %20 = arith.subf %19, %12 : vector<8x1xf32>
    %21 = math.exp %20 : vector<8x1xf32>
    %22 = arith.mulf %18, %21 : vector<8x1xf32>
    %cst_13 = arith.constant dense<0.000000e+00> : vector<8xf32>
    %23 = vector.multi_reduction <add>, %17, %cst_13 [1] : vector<8x16xf32> to vector<8xf32>
    %24 = vector.shape_cast %23 : vector<8xf32> to vector<8x1xf32>
    %25 = arith.addf %22, %24 : vector<8x1xf32>
    %c0_14 = arith.constant 0 : index
    %c0_15 = arith.constant 0 : index
    %26 = vector.load %arg6[%c0_14, %c0_15] : memref<8x1xf32, #tpu.memory_space<vmem>>, vector<8x1xf32>
    tpu.vector_store %arg6[%c0_14, %c0_15], %25 {strides = array<i32>} : memref<8x1xf32, #tpu.memory_space<vmem>>, vector<8x1xf32>,
    %c0_16 = arith.constant 0 : index
    %c0_17 = arith.constant 0 : index
    %27 = vector.load %arg5[%c0_16, %c0_17] : memref<8x1xf32, #tpu.memory_space<vmem>>, vector<8x1xf32>
    tpu.vector_store %arg5[%c0_16, %c0_17], %12 {strides = array<i32>} : memref<8x1xf32, #tpu.memory_space<vmem>>, vector<8x1xf32>,
    %c0_i32_18 = arith.constant 0 : i32
    %28 = arith.cmpi eq, %arg1, %c0_i32_18 : i32
    %29 = arith.extui %28 : i1 to i32
    %c0_i32_19 = arith.constant 0 : i32
    %30 = arith.cmpi ne, %29, %c0_i32_19 : i32
    scf.if %30 {
      %c0_20 = arith.constant 0 : index
      %c0_21 = arith.constant 0 : index
      %31 = vector.load %arg6[%c0_20, %c0_21] : memref<8x1xf32, #tpu.memory_space<vmem>>, vector<8x1xf32>
      %32 = math.log %31 : vector<8x1xf32>
      %c0_22 = arith.constant 0 : index
      %c0_23 = arith.constant 0 : index
      %33 = vector.load %arg5[%c0_22, %c0_23] : memref<8x1xf32, #tpu.memory_space<vmem>>, vector<8x1xf32>
      %34 = arith.addf %32, %33 : vector<8x1xf32>
      %35 = arith.subf %34, %2 : vector<8x1xf32>
      %36 = vector.shape_cast %35 : vector<8x1xf32> to vector<1x8x1xf32>
      %cst_24 = arith.constant dense<0.000000e+00> : vector<1xf32>
      %37 = vector.multi_reduction <add>, %36, %cst_24 [1, 2] : vector<1x8x1xf32> to vector<1xf32>
      %38 = vector.shape_cast %37 : vector<1xf32> to vector<1x1x1xf32>
      %39 = vector.extract %38[0, 0, 0] : f32 from vector<1x1x1xf32>
      %40 = tpu.iota {dimensions = array<i32: 0>} : vector<8x128xi32>
      %41 = tpu.iota {dimensions = array<i32: 1>} : vector<8x128xi32>
      %c0_i32_25 = arith.constant 0 : i32
      %42 = vector.broadcast %c0_i32_25 : i32 to vector<8x128xi32>
      %43 = arith.cmpi eq, %40, %42 : vector<8x128xi32>
      %c0_i32_26 = arith.constant 0 : i32
      %44 = vector.broadcast %c0_i32_26 : i32 to vector<8x128xi32>
      %45 = arith.cmpi eq, %41, %44 : vector<8x128xi32>
      %46 = arith.andi %43, %45 : vector<8x128xi1>
      %cst_27 = arith.constant 0.000000e+00 : f32
      %47 = vector.broadcast %39 : f32 to vector<8x128xf32>
      %48 = vector.broadcast %cst_27 : f32 to vector<8x128xf32>
      %49 = arith.select %46, %47, %48 : vector<8x128xi1>, vector<8x128xf32>
      %50 = vector.shape_cast %49 : vector<8x128xf32> to vector<1x8x128xf32>
      %c0_28 = arith.constant 0 : index
      %c0_29 = arith.constant 0 : index
      %c0_30 = arith.constant 0 : index
      %51 = vector.load %arg4[%c0_28, %c0_29, %c0_30] : memref<1x8x128xf32, #tpu.memory_space<vmem>>, vector<1x8x128xf32>
      tpu.vector_store %arg4[%c0_28, %c0_29, %c0_30], %50 {strides = array<i32>} : memref<1x8x128xf32, #tpu.memory_space<vmem>>, vector<1x8x128xf32>,
    } else {
    }
    return
  }
  func.func @transform_0(%arg0: i32, %arg1: i32) -> (i32, i32) {
    %c0_i32 = arith.constant 0 : i32
    %c0_i32_0 = arith.constant 0 : i32
    return %arg0, %c0_i32 : i32, i32
  }
  func.func @transform_1(%arg0: i32, %arg1: i32) -> (i32, i32) {
    %c0_i32 = arith.constant 0 : i32
    return %arg0, %arg1 : i32, i32
  }
  func.func @transform_2(%arg0: i32, %arg1: i32) -> (i32, i32, i32) {
    %c0_i32 = arith.constant 0 : i32
    %c0_i32_0 = arith.constant 0 : i32
    %c0_i32_1 = arith.constant 0 : i32
    return %arg0, %c0_i32, %c0_i32_0 : i32, i32, i32
  }
}

</mosaic_0001>

<bundles_post_ra>
// kernel: tpu_custom_call.1
= control target key start
LH: loop header
LB: loop body
LE: loop exit
PB: predicated region body
PF: predicated region fallthrough
CT: control target
= control target key end

     0   :  { %7 = vsyncpa [#allocation5], 0  ;;  %s268_s0 = inlined_call_operand.hbm [shape: f32[8,1], index: 0, kind: input, shape index: {}]   ;;  %s269_s1 = inlined_call_operand.hbm [shape: f32[8,16], index: 1, kind: input, shape index: {}]   ;;  %s270_s2 = inlined_call_operand.hbm [shape: f32[1,8,128], index: 2, kind: output, shape index: {}]  }
   0x1   :  { %8 = vsyncpa [#allocation8], 0 }
   0x2   :  { %9 = vsyncpa [#allocation6], 0  ;;  %s205_s9 = smov [#allocation4]   ;;  %s206_s11 = smov [#allocation7]  }
   0x3   :  { %s16_s10 = sshll.u32 %s205_s9, 4  ;;  %s26_s12 = sshll.u32 %s206_s11, 4  ;;  %s17_s10 = int_to_ptr.vmem [resolvable:$true] %s16_s10  ;;  %s27_s12 = int_to_ptr.vmem [resolvable:$true] %s26_s12 }
   0x4   :  { %s133_s15 = scalar_lea.hbm %s268_s0, 128 }
   0x5   :  { %p134_p0 = scmp.ne.s32.totalorder %s268_s0, %s133_s15  ;;  %p137_p1 = scmp.lt.u32.totalorder %s133_s15, %s268_s0 }
   0x7   :  { %p139_p2 = pnand %p137_p1, %p134_p0 }
   0x9   :  { %142 = shalt.err (!%p139_p2)
}
   0xa   :  { %s143_s20 = scalar_lea.vmem %s17_s10, 128  ;;  %p148_p4 = scmp.lt.s32.totalorder %s17_s10, %s17_s10 }
   0xb   :  { %p144_p3 = scmp.ne.s32.totalorder %s17_s10, %s143_s20  ;;  %p149_p5 = scmp.lt.s32.totalorder %s143_s20, %s143_s20 }
   0xd   :  { %p150_p6 = por %p149_p5, %p148_p4 }
   0xf   :  { %p151_p7 = pnand %p150_p6, %p144_p3 }
  0x11   :  { %154 = shalt.err (!%p151_p7)
}
  0x12   :  { %19 = dma.hbm_to_vmem [thread:$0]  %s268_s0, 128, %s17_s10, [#allocation5]  }
  0x13   :  { %s155_s25 = scalar_lea.hbm %s269_s1, 128 }
  0x14   :  { %p156_p8 = scmp.ne.s32.totalorder %s269_s1, %s155_s25  ;;  %p159_p9 = scmp.lt.u32.totalorder %s155_s25, %s269_s1 }
  0x16   :  { %p161_p10 = pnand %p159_p9, %p156_p8 }
  0x18   :  { %164 = shalt.err (!%p161_p10)
}
  0x19   :  { %s165_s30 = scalar_lea.vmem %s27_s12, 128  ;;  %p170_p12 = scmp.lt.s32.totalorder %s27_s12, %s27_s12 }
  0x1a   :  { %p166_p11 = scmp.ne.s32.totalorder %s27_s12, %s165_s30  ;;  %p171_p13 = scmp.lt.s32.totalorder %s165_s30, %s165_s30 }
  0x1c   :  { %p172_p0 = por %p171_p13, %p170_p12 }
  0x1e   :  { %p173_p1 = pnand %p172_p0, %p166_p11 }
  0x20   :  { %176 = shalt.err (!%p173_p1)
}
  0x21   :  { %29 = dma.hbm_to_vmem [thread:$0]  %s269_s1, 128, %s27_s12, [#allocation8]  }
  0x22   :  { %199 = dma.done.wait [#allocation5], 128  }
  0x23   :  { %200 = vsyncadd [#allocation5], 4294967168 }
  0x24   :  { %201 = dma.done.wait [#allocation8], 128  }
  0x25   :  { %202 = vsyncadd [#allocation8], 4294967168  ;;  %vm46_vm0 = vcmask 130048   ;;  %v45_v0 = vld [vmem:[#allocation7] sm:$0xff]  ;;  %vm42_vm1 = vcmask 7168   ;;  %v36_v2 = vld [vmem:[#allocation4] sm:$0xff]  ;;  %v93_v37 = vlaneseq }
  0x26   :  { %v47_v1 = vsel %vm46_vm0, %v45_v0, -inf  ;;  %v37_v3 = vmul.f32 5.0, %v36_v2  ;;  %v207_v4 = vmov 0   ;;  %v208_v5 = vmov 1.0   ;;  %s209_s1 = smov [#allocation9]  }
  0x27   :  { %48 = vmax.xlane.f32.xlu0 %v47_v1  ;;  %44 = vst.msk [vmem:[#allocation3] sm:$0xff] %vm42_vm1, %v208_v5  ;;  %v53_v11 = vmul.f32 5.0, %v45_v0  ;;  %v94_v38 = vshrl.u32 %v93_v37, 7  ;;  %v96_v39 = vand.u32 127, %v93_v37  ;;  %s109_s4 = sshll.u32 %s209_s1, 4  ;;  %s110_s4 = int_to_ptr.vmem [resolvable:$true] %s109_s4 }
  0x28   :  { %43 = vst.msk [vmem:[#allocation2] sm:$0xff] %vm42_vm1, %v37_v3  ;;  %126 = vset.pattern.permute.xlu0 %v207_v4  ;;  %s177_s6 = scalar_lea.vmem %s110_s4, 128  ;;  %p182_p3 = scmp.lt.s32.totalorder %s110_s4, %s110_s4 }
  0x29   :  { %vm97_vm2 = vcmp.eq.s32.totalorder %v94_v38, 0  ;;  %vm98_vm3 = vcmp.eq.s32.totalorder %v96_v39, 0  ;;  %p178_p2 = scmp.ne.s32.totalorder %s110_s4, %s177_s6  ;;  %p183_p4 = scmp.lt.s32.totalorder %s177_s6, %s177_s6 }
  0x2a   :  { %vm99_vm4 = vmand %vm97_vm2, %vm98_vm3 }
  0x2b   :  { %p184_p5 = por %p183_p4, %p182_p3 }
  0x2d   :  { %p185_p6 = pnand %p184_p5, %p178_p2 }
  0x2e   :  { %v62_v19 = vld [vmem:[#allocation3] sm:$0xff] }
  0x2f   :  { %v51_v7 = vld [vmem:[#allocation2] sm:$0xff] }
  0xb4   :  { %v49_v6 = vpop.xlane.xlu0 %48 }
  0xb5   :  { %v50_v8 = vmul.f32 5.0, %v49_v6 }
  0xb7   :  { %v52_v9 = vmax.f32 %v51_v7, %v50_v8 }
  0xb9   :  { %v63_v10 = vsub.f32 %v51_v7, %v52_v9  ;;  %73 = vst.msk [vmem:[#allocation2] sm:$0xff] %vm42_vm1, %v52_v9  ;;  %56 = vperm.xlu0 %126, %v52_v9  }
  0xbb   :  { %v64_v17 = vmul.f32 1.442695, %v63_v10 }
  0xc0   :  { %v80_v26 = vld [vmem:[#allocation2] sm:$0xff] }
 0x138   :  { %v57_v12 = vpop.permute.xlu0 %56 }
 0x139   :  { %v59_v13 = vsub.f32 %v53_v11, %v57_v12 }
 0x13b   :  { %v60_v14 = vmul.f32 1.442695, %v59_v13 }
 0x13d   :  { %127 = vpow2.f32 %v60_v14 }
 0x13e   :  { %129 = vpow2.f32 %v64_v17 }
 0x147   :  { %v128_v15 = vpop.eup %127 }
 0x148   :  { %v67_v16 = vsel %vm46_vm0, %v128_v15, 0.0  ;;  %v130_v18 = vpop.eup %129 }
 0x149   :  { %68 = vadd.xlane.f32.xlu1 %v67_v16  ;;  %v66_v20 = vmul.f32 %v130_v18, %v62_v19 }
 0x1d6   :  { %v69_v21 = vpop.xlane.xlu1 %68 }
 0x1d7   :  { %v70_v22 = vadd.f32 %v69_v21, %v66_v20 }
 0x1d9   :  { %72 = vst.msk [vmem:[#allocation3] sm:$0xff] %vm42_vm1, %v70_v22 }
 0x1e0   :  { %v77_v23 = vld [vmem:[#allocation3] sm:$0xff] }
 0x1e1   :  { %131 = vlog2.f32 %v77_v23 }
 0x1eb   :  { %v132_v24 = vpop.eup %131 }
 0x1ec   :  { %v79_v25 = vmul.f32 0.6931472, %v132_v24 }
 0x1ee   :  { %v81_v27 = vadd.f32 %v80_v26, %v79_v25 }
 0x1f0   :  { %v82_v28 = vsub.f32 %v81_v27, %v37_v3 }
 0x1f2   :  { %v83_v29 = vsel %vm42_vm1, %v82_v28, 0.0 }
 0x1f3   :  { %84 = vadd.xlane.f32.xlu1 %v83_v29 }
 0x280   :  { %v85_v30 = vpop.xlane.xlu1 %84 }
 0x281   :  { %v86_v31 = vrot.slane %v85_v30, 4 }
 0x283   :  { %v87_v32 = vadd.f32 %v86_v31, %v85_v30 }
 0x285   :  { %v88_v33 = vrot.slane %v87_v32, 2 }
 0x287   :  { %v89_v34 = vadd.f32 %v88_v33, %v87_v32 }
 0x289   :  { %v90_v35 = vrot.slane %v89_v34, 1 }
 0x28b   :  { %v91_v36 = vadd.f32 %v90_v35, %v89_v34 }
 0x28d   :  { %119 = vpush %v91_v36 }
 0x2be   :  { %s120_s5 = spop %119 }
 0x2bf   :  { %v100_v40 = vstv %s120_s5 }
 0x2c0   :  { %v101_v41 = vsel %vm99_vm4, %v100_v40, 0.0 }
 0x2c1   :  { %102 = vst [vmem:[#allocation9] sm:$0xff] %v101_v41 }
 0x2c2   :  { %188 = shalt.err (!%p185_p6)
}
 0x2c3   :  { %s189_s9 = scalar_lea.hbm %s270_s2, 128 }
 0x2c4   :  { %p190_p7 = scmp.ne.s32.totalorder %s270_s2, %s189_s9  ;;  %p193_p8 = scmp.lt.u32.totalorder %s189_s9, %s270_s2 }
 0x2c6   :  { %p195_p9 = pnand %p193_p8, %p190_p7 }
 0x2c8   :  { %198 = shalt.err (!%p195_p9)
}
 0x2c9   :  { %112 = dma.vmem_to_hbm [thread:$0]  %s110_s4, 128, %s270_s2, [#allocation6]  }
 0x2ca   :  { %203 = dma.done.wait [#allocation6], 128  }
 0x2cb   :  { %204 = vsyncadd [#allocation6], 4294967168 }
 0x2cc   :  { %116 = vsyncpa [#allocation5], 1 }
 0x2cd   :  { %117 = vsyncpa [#allocation8], 1 }
 0x2ce   :  { %118 = vsyncpa [#allocation6], 1 }

</bundles_post_ra>
